<compile_context>
chip_gen: v6e
topology: v6e:2x2x1
jax: 0.10.0
libtpu: 0.0.40
codegen_flags: <defaults>
</compile_context>

<pallas_src>
import functools

import jax
import jax.numpy as jnp
from jax import lax
from jax.experimental import pallas as pl
from jax.experimental.pallas import tpu as pltpu


def _round_up(x, m):
    return ((x + m - 1) // m) * m


def _label_smoothing_ce_kernel(logits_ref, targets_ref, out_ref, *, epsilon, n_total):
    i = pl.program_id(0)

    x = logits_ref[...].astype(jnp.float32)        # (TILE_N, C), cast in-kernel
    t = targets_ref[...]                           # (TILE_N, 1) int32
    tile_n, c = x.shape

    # Numerically stable log-softmax pieces: log_p = z - logz, z = x - max.
    m = jnp.max(x, axis=1, keepdims=True)          # (TILE_N, 1)
    z = x - m
    logz = jnp.log(jnp.sum(jnp.exp(z), axis=1, keepdims=True))   # (TILE_N, 1)

    # Fused lane reduction:
    #   per_sample = (eps/C)*(-sum_c log_p) + (1-2eps)*(-log_p[target])
    #              = (1-eps)*logz - sum_c z_c * w_c,
    #   with w_c = eps/C + (1-2eps)*[c == t].
    col = lax.broadcasted_iota(jnp.int32, (tile_n, c), 1)
    w = (epsilon / c) + (1.0 - 2.0 * epsilon) * (col == t).astype(jnp.float32)
    weighted = jnp.sum(z * w, axis=1, keepdims=True)             # (TILE_N, 1)
    per_sample = (1.0 - epsilon) * logz - weighted

    # Mask rows of a ragged last tile that fall beyond N (padded garbage rows).
    row = lax.broadcasted_iota(jnp.int32, (tile_n, 1), 0) + i * tile_n
    per_sample = jnp.where(row < n_total, per_sample, 0.0)

    # One partial sum per grid step, written into this tile's own output block
    # (lane/sublane-aligned (1, 8, 128) slab -> unmasked store, megacore-safe).
    out_ref[...] = jnp.full(out_ref.shape, jnp.sum(per_sample), dtype=jnp.float32)


def _pick_tile(n, c, dtype, *, budget_bytes=24 * 1024 * 1024, max_rows=None):
    """VMEM- and C-aware row-tile selection (dtype-aware sublane alignment)."""
    itemsize = jnp.dtype(dtype).itemsize
    sublane = max(8, 32 // itemsize)          # 8 for f32, 16 for bf16, 32 for int8/fp8
    c_pad = _round_up(c, 128)                 # lane padding in VMEM
    # Per-row VMEM cost: double-buffered native-dtype input + ~4 live f32 temps.
    bytes_per_row = 2 * c_pad * itemsize + 4 * c_pad * 4
    rows = max(sublane, budget_bytes // bytes_per_row)
    if max_rows is not None:
        rows = min(rows, max_rows)
    if rows >= n:
        return n                              # full-array block: always legal
    return max(sublane, (rows // sublane) * sublane)


def label_smoothing_cross_entropy(preds, target, *, epsilon=0.1, reduction="mean",
                                  max_tile_rows=None):
    """preds: (N, C) float, target: (N,) int. Returns a scalar f32 loss."""
    assert reduction in ("mean", "sum")
    n, c = preds.shape
    tile_n = _pick_tile(n, c, preds.dtype, max_rows=max_tile_rows)
    num_tiles = pl.cdiv(n, tile_n)

    # Raise the scoped VMEM limit to match the chosen tile (v5e default is only
    # 16 MiB); stays well under v7x's 64 MiB physical VMEM.
    itemsize = jnp.dtype(preds.dtype).itemsize
    c_pad = _round_up(c, 128)
    in_bytes = tile_n * c_pad * itemsize
    f32_bytes = tile_n * c_pad * 4
    vmem_limit = 2 * in_bytes + 8 * f32_bytes + (2 << 20)
    vmem_limit = int(min(max(vmem_limit, 16 * 1024 * 1024), 56 * 1024 * 1024))

    kernel = functools.partial(_label_smoothing_ce_kernel,
                               epsilon=float(epsilon), n_total=n)

    partials = pl.pallas_call(
        kernel,
        out_shape=jax.ShapeDtypeStruct((num_tiles, 8, 128), jnp.float32),
        grid_spec=pltpu.PrefetchScalarGridSpec(
            num_scalar_prefetch=0,
            grid=(num_tiles,),
            in_specs=[
                pl.BlockSpec((tile_n, c), lambda i: (i, 0)),   # logits tile (native dtype)
                pl.BlockSpec((tile_n, 1), lambda i: (i, 0)),   # targets tile (int32)
            ],
            out_specs=pl.BlockSpec((1, 8, 128), lambda i: (i, 0, 0)),
        ),
        # Independent per-tile partials -> batch axis is "parallel" (both v7x TCs).
        compiler_params=pltpu.CompilerParams(
            dimension_semantics=("parallel",),
            vmem_limit_bytes=vmem_limit,
        ),
    )(preds, target.reshape(n, 1).astype(jnp.int32))

    total = jnp.sum(partials[:, 0, 0])
    if reduction == "mean":
        total = total / jnp.float32(n)
    return total


def _reference(preds, target, *, epsilon=0.1, reduction="mean"):
    """Pure-JAX reference mirroring the PyTorch forward (linear_combination uses 1-2*eps)."""
    log_preds = jax.nn.log_softmax(preds.astype(jnp.float32), axis=-1)
    c = preds.shape[-1]
    red = jnp.mean if reduction == "mean" else jnp.sum
    loss = red(-jnp.sum(log_preds, axis=-1))
    nll = red(-jnp.take_along_axis(log_preds,
                                   target[:, None].astype(jnp.int32), axis=-1)[:, 0])
    return epsilon * (loss / c) + (1.0 - 2.0 * epsilon) * nll


if __name__ == "__main__":
    key = jax.random.PRNGKey(0)
    N, C = 200, 64                     # N deliberately not a power of two
    k1, k2 = jax.random.split(key)

    preds = jax.random.normal(k1, (N, C), dtype=jnp.float32)
    target = jax.random.randint(k2, (N,), 0, C, dtype=jnp.int32)

    # Default path: single full-array tile.
    loss = label_smoothing_cross_entropy(preds, target, epsilon=0.1, reduction="mean")
    jax.block_until_ready(loss)
    ref = _reference(preds, target, epsilon=0.1, reduction="mean")
    assert jnp.allclose(loss, ref, rtol=1e-4, atol=1e-4), (loss, ref)

    # Multi-tile path with a ragged last tile (exercises cdiv grid + row masking
    # and the per-tile-partials / parallel-axis reduction).
    loss2 = label_smoothing_cross_entropy(preds, target, epsilon=0.1, reduction="sum",
                                          max_tile_rows=64)
    jax.block_until_ready(loss2)
    ref2 = _reference(preds, target, epsilon=0.1, reduction="sum")
    assert jnp.allclose(loss2, ref2, rtol=1e-4, atol=1e-4), (loss2, ref2)

    print("KERNEL_OK")
</pallas_src>

<mosaic_0001>
module attributes {stable_mosaic.version = 11 : i64} {
  func.func @_label_smoothing_ce_kernel(%arg0: i32, %arg1: memref<200x64xf32, #tpu.memory_space<vmem>>, %arg2: memref<200x1xi32, #tpu.memory_space<vmem>>, %arg3: memref<1x8x128xf32, #tpu.memory_space<vmem>>) attributes {dimension_semantics = [#tpu.dimension_semantics<parallel>], iteration_bounds = array<i64: 1>, scalar_prefetch = 0 : i64, scratch_operands = 0 : i64, tpu.core_type = #tpu.core_type<tc>, window_params = [{transform_indices = @transform_0, window_bounds = array<i64: 200, 64>}, {transform_indices = @transform_1, window_bounds = array<i64: 200, 1>}, {transform_indices = @transform_2, window_bounds = array<i64: 1, 8, 128>}]} {
    %c0 = arith.constant 0 : index
    %c0_0 = arith.constant 0 : index
    %0 = vector.load %arg1[%c0, %c0_0] : memref<200x64xf32, #tpu.memory_space<vmem>>, vector<200x64xf32>
    %c0_1 = arith.constant 0 : index
    %c0_2 = arith.constant 0 : index
    %1 = vector.load %arg2[%c0_1, %c0_2] : memref<200x1xi32, #tpu.memory_space<vmem>>, vector<200x1xi32>
    %cst = arith.constant dense<0xFF800000> : vector<200xf32>
    %2 = vector.multi_reduction <maximumf>, %0, %cst [1] : vector<200x64xf32> to vector<200xf32>
    %3 = vector.shape_cast %2 : vector<200xf32> to vector<200x1xf32>
    %4 = vector.broadcast %3 : vector<200x1xf32> to vector<200x64xf32>
    %5 = arith.subf %0, %4 : vector<200x64xf32>
    %6 = math.exp %5 : vector<200x64xf32>
    %cst_3 = arith.constant dense<0.000000e+00> : vector<200xf32>
    %7 = vector.multi_reduction <add>, %6, %cst_3 [1] : vector<200x64xf32> to vector<200xf32>
    %8 = vector.shape_cast %7 : vector<200xf32> to vector<200x1xf32>
    %9 = math.log %8 : vector<200x1xf32>
    %10 = tpu.iota {dimensions = array<i32: 1>} : vector<200x64xi32>
    %11 = vector.broadcast %1 : vector<200x1xi32> to vector<200x64xi32>
    %12 = arith.cmpi eq, %10, %11 : vector<200x64xi32>
    %13 = arith.extui %12 : vector<200x64xi1> to vector<200x64xi32>
    %14 = arith.sitofp %13 : vector<200x64xi32> to vector<200x64xf32>
    %cst_4 = arith.constant 8.000000e-01 : f32
    %15 = vector.broadcast %cst_4 : f32 to vector<200x64xf32>
    %16 = arith.mulf %15, %14 : vector<200x64xf32>
    %cst_5 = arith.constant 1.562500e-03 : f32
    %17 = vector.broadcast %cst_5 : f32 to vector<200x64xf32>
    %18 = arith.addf %17, %16 : vector<200x64xf32>
    %19 = arith.mulf %5, %18 : vector<200x64xf32>
    %cst_6 = arith.constant dense<0.000000e+00> : vector<200xf32>
    %20 = vector.multi_reduction <add>, %19, %cst_6 [1] : vector<200x64xf32> to vector<200xf32>
    %21 = vector.shape_cast %20 : vector<200xf32> to vector<200x1xf32>
    %cst_7 = arith.constant 0.899999976 : f32
    %22 = vector.broadcast %cst_7 : f32 to vector<200x1xf32>
    %23 = arith.mulf %22, %9 : vector<200x1xf32>
    %24 = arith.subf %23, %21 : vector<200x1xf32>
    %25 = tpu.iota {dimensions = array<i32: 0>} : vector<200x1xi32>
    %c200_i32 = arith.constant 200 : i32
    %26 = arith.muli %arg0, %c200_i32 : i32
    %27 = vector.broadcast %26 : i32 to vector<200x1xi32>
    %28 = arith.addi %25, %27 : vector<200x1xi32>
    %c200_i32_8 = arith.constant 200 : i32
    %29 = vector.broadcast %c200_i32_8 : i32 to vector<200x1xi32>
    %30 = arith.cmpi slt, %28, %29 : vector<200x1xi32>
    %cst_9 = arith.constant 0.000000e+00 : f32
    %31 = vector.broadcast %cst_9 : f32 to vector<200x1xf32>
    %32 = arith.select %30, %24, %31 : vector<200x1xi1>, vector<200x1xf32>
    %33 = vector.shape_cast %32 : vector<200x1xf32> to vector<1x200x1xf32>
    %cst_10 = arith.constant dense<0.000000e+00> : vector<1xf32>
    %34 = vector.multi_reduction <add>, %33, %cst_10 [1, 2] : vector<1x200x1xf32> to vector<1xf32>
    %35 = vector.shape_cast %34 : vector<1xf32> to vector<1x1x1xf32>
    %36 = vector.extract %35[0, 0, 0] : f32 from vector<1x1x1xf32>
    %37 = vector.broadcast %36 : f32 to vector<1x8x128xf32>
    %c0_11 = arith.constant 0 : index
    %c0_12 = arith.constant 0 : index
    %c0_13 = arith.constant 0 : index
    %38 = vector.load %arg3[%c0_11, %c0_12, %c0_13] : memref<1x8x128xf32, #tpu.memory_space<vmem>>, vector<1x8x128xf32>
    tpu.vector_store %arg3[%c0_11, %c0_12, %c0_13], %37 {strides = array<i32>} : memref<1x8x128xf32, #tpu.memory_space<vmem>>, vector<1x8x128xf32>,
    return
  }
  func.func @transform_0(%arg0: i32) -> (i32, i32) {
    %c0_i32 = arith.constant 0 : i32
    %c0_i32_0 = arith.constant 0 : i32
    return %arg0, %c0_i32 : i32, i32
  }
  func.func @transform_1(%arg0: i32) -> (i32, i32) {
    %c0_i32 = arith.constant 0 : i32
    %c0_i32_0 = arith.constant 0 : i32
    return %arg0, %c0_i32 : i32, i32
  }
  func.func @transform_2(%arg0: i32) -> (i32, i32, i32) {
    %c0_i32 = arith.constant 0 : i32
    %c0_i32_0 = arith.constant 0 : i32
    %c0_i32_1 = arith.constant 0 : i32
    return %arg0, %c0_i32, %c0_i32_0 : i32, i32, i32
  }
}

</mosaic_0001>

<bundles_post_ra>
// kernel: tpu_custom_call.1
= control target key start
LH: loop header
LB: loop body
LE: loop exit
PB: predicated region body
PF: predicated region fallthrough
CT: control target
= control target key end

     0   :  { %vm62_vm0 = vcmask 523264   ;;  %v1022_v6 = vmov 0   ;;  %s1608_s0 = inlined_call_operand.vmem [shape: f32[200,64], index: 0, kind: input, shape index: {}]   ;;  %s1609_s1 = inlined_call_operand.vmem [shape: s32[200,1], index: 1, kind: input, shape index: {}]   ;;  %s1610_s2 = inlined_call_operand.hbm [shape: f32[1,8,128], index: 2, kind: output, shape index: {}]  }
   0x1   :  { %v1043_v0 = vld [vmem:[%s1608_s0 + $0x10] sm:$0xff]  ;;  %v1048_v1 = vld [vmem:[%s1608_s0] sm:$0xff]  ;;  %v1053_v2 = vld [vmem:[%s1608_s0 + $0x18] sm:$0xff]  ;;  %898 = vset.pattern.permute.xlu1 %v1022_v6  ;;  %899 = vset.pattern.permute.xlu0 %v1022_v6 }
   0x2   :  { %v69_v3 = vsel %vm62_vm0, %v1043_v0, -inf  ;;  %v63_v4 = vsel %vm62_vm0, %v1048_v1, -inf  ;;  %v1062_v5 = vld [vmem:[%s1608_s0 + $0x8] sm:$0xff]  ;;  %v72_v7 = vsel %vm62_vm0, %v1053_v2, -inf  ;;  %v1076_v10 = vld [vmem:[%s1608_s0 + $0x20] sm:$0xff]  ;;  %v1085_v13 = vld [vmem:[%s1608_s0 + $0x38] sm:$0xff] }
   0x3   :  { %70 = vmax.xlane.f32.xlu1 %v69_v3  ;;  %64 = vmax.xlane.f32.xlu0 %v63_v4  ;;  %v66_v8 = vsel %vm62_vm0, %v1062_v5, -inf  ;;  %v1071_v9 = vld [vmem:[%s1608_s0 + $0x28] sm:$0xff]  ;;  %v75_v12 = vsel %vm62_vm0, %v1076_v10, -inf  ;;  %v1090_v14 = vld [vmem:[%s1608_s0 + $0x30] sm:$0xff]  ;;  %v84_v15 = vsel %vm62_vm0, %v1085_v13, -inf  ;;  %v1104_v18 = vld [vmem:[%s1608_s0 + $0x40] sm:$0xff] }
   0x4   :  { %v78_v11 = vsel %vm62_vm0, %v1071_v9, -inf  ;;  %v81_v16 = vsel %vm62_vm0, %v1090_v14, -inf  ;;  %v1099_v17 = vld [vmem:[%s1608_s0 + $0x48] sm:$0xff]  ;;  %v87_v20 = vsel %vm62_vm0, %v1104_v18, -inf  ;;  %v1113_v21 = vld [vmem:[%s1608_s0 + $0x58] sm:$0xff]  ;;  %v1118_v22 = vld [vmem:[%s1608_s0 + $0x50] sm:$0xff] }
   0x5   :  { %v90_v19 = vsel %vm62_vm0, %v1099_v17, -inf }
   0x7   :  { %73 = vmax.xlane.f32.xlu1 %v72_v7  ;;  %67 = vmax.xlane.f32.xlu0 %v66_v8 }
   0xb   :  { %79 = vmax.xlane.f32.xlu1 %v78_v11  ;;  %76 = vmax.xlane.f32.xlu0 %v75_v12 }
   0xf   :  { %85 = vmax.xlane.f32.xlu1 %v84_v15  ;;  %82 = vmax.xlane.f32.xlu0 %v81_v16 }
  0x10   :  { %7 = vsyncpa [#allocation3], 0  ;;  %v96_v23 = vsel %vm62_vm0, %v1113_v21, -inf  ;;  %v93_v24 = vsel %vm62_vm0, %v1118_v22, -inf  ;;  %v1127_v25 = vld [vmem:[%s1608_s0 + $0x68] sm:$0xff]  ;;  %v1132_v26 = vld [vmem:[%s1608_s0 + $0x60] sm:$0xff] }
  0x11   :  { %v102_v27 = vsel %vm62_vm0, %v1127_v25, -inf  ;;  %v99_v28 = vsel %vm62_vm0, %v1132_v26, -inf  ;;  %v1141_v29 = vld [vmem:[%s1608_s0 + $0x78] sm:$0xff]  ;;  %v1146_v30 = vld [vmem:[%s1608_s0 + $0x70] sm:$0xff]  ;;  %v1155_v33 = vld [vmem:[%s1608_s0 + $0x88] sm:$0xff] }
  0x12   :  { %v108_v31 = vsel %vm62_vm0, %v1141_v29, -inf  ;;  %v105_v32 = vsel %vm62_vm0, %v1146_v30, -inf  ;;  %v1160_v34 = vld [vmem:[%s1608_s0 + $0x80] sm:$0xff]  ;;  %v114_v35 = vsel %vm62_vm0, %v1155_v33, -inf  ;;  %v1169_v37 = vld [vmem:[%s1608_s0 + $0x98] sm:$0xff]  ;;  %v1174_v38 = vld [vmem:[%s1608_s0 + $0x90] sm:$0xff] }
  0x13   :  { %91 = vmax.xlane.f32.xlu1 %v90_v19  ;;  %88 = vmax.xlane.f32.xlu0 %v87_v20  ;;  %v111_v36 = vsel %vm62_vm0, %v1160_v34, -inf  ;;  %v120_v39 = vsel %vm62_vm0, %v1169_v37, -inf  ;;  %v117_v40 = vsel %vm62_vm0, %v1174_v38, -inf  ;;  %v1183_v41 = vld [vmem:[%s1608_s0 + $0xa8] sm:$0xff]  ;;  %v1188_v42 = vld [vmem:[%s1608_s0 + $0xa0] sm:$0xff]  ;;  %v1197_v45 = vld [vmem:[%s1608_s0 + $0xb8] sm:$0xff] }
  0x14   :  { %v126_v43 = vsel %vm62_vm0, %v1183_v41, -inf  ;;  %v123_v44 = vsel %vm62_vm0, %v1188_v42, -inf  ;;  %v1202_v46 = vld [vmem:[%s1608_s0 + $0xb0] sm:$0xff]  ;;  %v132_v47 = vsel %vm62_vm0, %v1197_v45, -inf  ;;  %v1211_v49 = vld [vmem:[%s1608_s0 + $0xc0] sm:$0xff]  ;;  %v40_v52 = vld [vmem:[%s1609_s1 + $0x18] sm:$0xff] }
  0x15   :  { %v129_v48 = vsel %vm62_vm0, %v1202_v46, -inf  ;;  %v135_v50 = vsel %vm62_vm0, %v1211_v49, -inf  ;;  %v37_v51 = vld [vmem:[%s1609_s1] sm:$0xff]  ;;  %v42_v53 = vld [vmem:[%s1609_s1 + $0x28] sm:$0xff]  ;;  %v44_v55 = vld [vmem:[%s1609_s1 + $0x38] sm:$0xff] }
  0x16   :  { %v38_v54 = vld [vmem:[%s1609_s1 + $0x8] sm:$0xff]  ;;  %v39_v56 = vld [vmem:[%s1609_s1 + $0x10] sm:$0xff]  ;;  %v45_v57 = vld [vmem:[%s1609_s1 + $0x40] sm:$0xff] }
  0x17   :  { %97 = vmax.xlane.f32.xlu1 %v96_v23  ;;  %94 = vmax.xlane.f32.xlu0 %v93_v24  ;;  %v41_v58 = vld [vmem:[%s1609_s1 + $0x20] sm:$0xff]  ;;  %v46_v59 = vld [vmem:[%s1609_s1 + $0x48] sm:$0xff]  ;;  %v43_v60 = vld [vmem:[%s1609_s1 + $0x30] sm:$0xff] }
  0x18   :  { %v47_v61 = vld [vmem:[%s1609_s1 + $0x50] sm:$0xff]  ;;  %v49_v62 = vld [vmem:[%s1609_s1 + $0x60] sm:$0xff]  ;;  %v48_v63 = vld [vmem:[%s1609_s1 + $0x58] sm:$0xff] }
  0x19   :  { %v55_v3 = vld [vmem:[%s1609_s1 + $0x90] sm:$0xff]  ;;  %v50_v4 = vld [vmem:[%s1609_s1 + $0x68] sm:$0xff]  ;;  %v57_v6 = vld [vmem:[%s1609_s1 + $0xa0] sm:$0xff] }
  0x1a   :  { %v51_v7 = vld [vmem:[%s1609_s1 + $0x70] sm:$0xff]  ;;  %v52_v11 = vld [vmem:[%s1609_s1 + $0x78] sm:$0xff]  ;;  %v61_v12 = vld [vmem:[%s1609_s1 + $0xc0] sm:$0xff] }
  0x1b   :  { %103 = vmax.xlane.f32.xlu1 %v102_v27  ;;  %100 = vmax.xlane.f32.xlu0 %v99_v28  ;;  %v59_v8 = vld [vmem:[%s1609_s1 + $0xb0] sm:$0xff]  ;;  %v53_v15 = vld [vmem:[%s1609_s1 + $0x80] sm:$0xff]  ;;  %v54_v16 = vld [vmem:[%s1609_s1 + $0x88] sm:$0xff] }
  0x1c   :  { %v56_v19 = vld [vmem:[%s1609_s1 + $0x98] sm:$0xff]  ;;  %v58_v20 = vld [vmem:[%s1609_s1 + $0xa8] sm:$0xff] }
  0x1d   :  { %v60_v23 = vld [vmem:[%s1609_s1 + $0xb8] sm:$0xff]  ;;  %s1024_s1 = smov [#allocation2]  }
  0x1e   :  { %s860_s23 = sshll.u32 %s1024_s1, 4  ;;  %s861_s23 = int_to_ptr.vmem [resolvable:$true] %s860_s23 }
  0x1f   :  { %109 = vmax.xlane.f32.xlu1 %v108_v31  ;;  %106 = vmax.xlane.f32.xlu0 %v105_v32  ;;  %s1000_s25 = scalar_lea.vmem %s861_s23, 128  ;;  %p1005_p1 = scmp.lt.s32.totalorder %s861_s23, %s861_s23 }
  0x20   :  { %p1001_p0 = scmp.ne.s32.totalorder %s861_s23, %s1000_s25  ;;  %p1006_p2 = scmp.lt.s32.totalorder %s1000_s25, %s1000_s25 }
  0x22   :  { %p1007_p3 = por %p1006_p2, %p1005_p1 }
  0x23   :  { %115 = vmax.xlane.f32.xlu1 %v114_v35  ;;  %112 = vmax.xlane.f32.xlu0 %v111_v36 }
  0x24   :  { %p1008_p4 = pnand %p1007_p3, %p1001_p0 }
  0x27   :  { %121 = vmax.xlane.f32.xlu1 %v120_v39  ;;  %118 = vmax.xlane.f32.xlu0 %v117_v40 }
  0x2b   :  { %127 = vmax.xlane.f32.xlu1 %v126_v43  ;;  %124 = vmax.xlane.f32.xlu0 %v123_v44 }
  0x2f   :  { %133 = vmax.xlane.f32.xlu1 %v132_v47  ;;  %130 = vmax.xlane.f32.xlu0 %v129_v48 }
  0x33   :  { %136 = vmax.xlane.f32.xlu0 %v135_v50 }
  0x40   :  { %341 = vperm.xlu1 %898, %v37_v51  }
  0x44   :  { %350 = vperm.xlu1 %898, %v40_v52  }
  0x48   :  { %356 = vperm.xlu1 %898, %v42_v53  }
  0x49   :  { %344 = vperm.xlu0 %899, %v38_v54  }
  0x4c   :  { %362 = vperm.xlu1 %898, %v44_v55  }
  0x4d   :  { %347 = vperm.xlu0 %899, %v39_v56  }
  0x50   :  { %365 = vperm.xlu1 %898, %v45_v57  }
  0x51   :  { %353 = vperm.xlu0 %899, %v41_v58  }
  0x54   :  { %368 = vperm.xlu1 %898, %v46_v59  }
  0x55   :  { %359 = vperm.xlu0 %899, %v43_v60  }
  0x58   :  { %371 = vperm.xlu1 %898, %v47_v61  }
  0x59   :  { %377 = vperm.xlu0 %899, %v49_v62  }
  0x5c   :  { %374 = vperm.xlu1 %898, %v48_v63  }
  0x5d   :  { %395 = vperm.xlu0 %899, %v55_v3  }
  0x60   :  { %380 = vperm.xlu1 %898, %v50_v4  }
  0x61   :  { %401 = vperm.xlu0 %899, %v57_v6  }
  0x64   :  { %383 = vperm.xlu1 %898, %v51_v7  }
  0x65   :  { %407 = vperm.xlu0 %899, %v59_v8  }
  0x68   :  { %386 = vperm.xlu1 %898, %v52_v11  }
  0x69   :  { %413 = vperm.xlu0 %899, %v61_v12  }
  0x6c   :  { %389 = vperm.xlu1 %898, %v53_v15  }
  0x70   :  { %392 = vperm.xlu1 %898, %v54_v16  }
  0x74   :  { %398 = vperm.xlu1 %898, %v56_v19  }
  0x78   :  { %404 = vperm.xlu1 %898, %v58_v20  }
  0x7c   :  { %410 = vperm.xlu1 %898, %v60_v23  }
  0x8c   :  { %v71_v24 = vpop.xlane.xlu1 %70  ;;  %v65_v27 = vpop.xlane.xlu0 %64 }
  0x8d   :  { %v1291_v28 = vsub.f32 %v1048_v1, %v65_v27  ;;  %v1295_v32 = vsub.f32 %v1043_v0, %v71_v24 }
  0x8f   :  { %v163_v31 = vmul.f32 1.442695, %v1291_v28  ;;  %v167_v1 = vmul.f32 1.442695, %v1295_v32 }
  0x90   :  { %v74_v35 = vpop.xlane.xlu1 %73  ;;  %v68_v36 = vpop.xlane.xlu0 %67 }
  0x91   :  { %v1298_v39 = vsub.f32 %v1053_v2, %v74_v35  ;;  %v1301_v40 = vsub.f32 %v1062_v5, %v68_v36  ;;  %900 = vpow2.f32 %v163_v31 }
  0x93   :  { %v169_v43 = vmul.f32 1.442695, %v1298_v39  ;;  %v165_v44 = vmul.f32 1.442695, %v1301_v40 }
  0x94   :  { %v80_v47 = vpop.xlane.xlu1 %79  ;;  %v77_v48 = vpop.xlane.xlu0 %76 }
  0x95   :  { %902 = vpow2.f32 %v169_v43  ;;  %v1307_v0 = vsub.f32 %v1071_v9, %v80_v47  ;;  %v1310_v50 = vsub.f32 %v1076_v10, %v77_v48 }
  0x96   :  { %904 = vpow2.f32 %v165_v44 }
  0x97   :  { %v173_v2 = vmul.f32 1.442695, %v1307_v0  ;;  %906 = vpow2.f32 %v167_v1  ;;  %v171_v5 = vmul.f32 1.442695, %v1310_v50 }
  0x98   :  { %v86_v51 = vpop.xlane.xlu1 %85  ;;  %v83_v52 = vpop.xlane.xlu0 %82 }
  0x99   :  { %908 = vpow2.f32 %v173_v2  ;;  %v1315_v53 = vsub.f32 %v1085_v13, %v86_v51  ;;  %v1318_v54 = vsub.f32 %v1090_v14, %v83_v52 }
  0x9a   :  { %910 = vpow2.f32 %v171_v5 }
  0x9b   :  { %v177_v9 = vmul.f32 1.442695, %v1315_v53  ;;  %v175_v10 = vmul.f32 1.442695, %v1318_v54 }
  0x9c   :  { %v92_v55 = vpop.xlane.xlu1 %91  ;;  %v89_v56 = vpop.xlane.xlu0 %88 }
  0x9d   :  { %912 = vpow2.f32 %v177_v9  ;;  %v1323_v57 = vsub.f32 %v1099_v17, %v92_v55  ;;  %v1326_v58 = vsub.f32 %v1104_v18, %v89_v56 }
  0x9e   :  { %v901_v59 = vpop.eup %900  ;;  %914 = vpow2.f32 %v175_v10 }
  0x9f   :  { %v181_v13 = vmul.f32 1.442695, %v1323_v57  ;;  %v179_v14 = vmul.f32 1.442695, %v1326_v58  ;;  %v213_v61 = vsel %vm62_vm0, %v901_v59, 0.0  ;;  %v338_v59 = vlaneseq }
  0xa0   :  { %v98_v60 = vpop.xlane.xlu1 %97  ;;  %v95_v62 = vpop.xlane.xlu0 %94  ;;  %214 = vadd.xlane.f32.xlu1 %v213_v61 }
  0xa1   :  { %916 = vpow2.f32 %v181_v13  ;;  %v1332_v63 = vsub.f32 %v1118_v22, %v95_v62  ;;  %v1348_v5 = vsub.f32 %v1113_v21, %v98_v60  ;;  %v1366_v61 = vand.u32 127, %v338_v59 }
  0xa2   :  { %v903_v17 = vpop.eup %902  ;;  %918 = vpow2.f32 %v179_v14 }
  0xa3   :  { %v905_v3 = vpop.eup %904  ;;  %v222_v18 = vsel %vm62_vm0, %v903_v17, 0.0  ;;  %v183_v4 = vmul.f32 1.442695, %v1332_v63  ;;  %v185_v55 = vmul.f32 1.442695, %v1348_v5 }
  0xa4   :  { %v104_v6 = vpop.xlane.xlu1 %103  ;;  %v216_v7 = vsel %vm62_vm0, %v905_v3, 0.0  ;;  %v101_v8 = vpop.xlane.xlu0 %100  ;;  %223 = vadd.xlane.f32.xlu1 %v222_v18  ;;  %v1023_v18 = vmov 0.0  }
  0xa5   :  { %v907_v11 = vpop.eup %906  ;;  %217 = vadd.xlane.f32.xlu0 %v216_v7  ;;  %920 = vpow2.f32 %v183_v4  ;;  %v1357_v56 = vsub.f32 %v1132_v26, %v101_v8  ;;  %v1363_v14 = vsub.f32 %v1127_v25, %v104_v6 }
  0xa6   :  { %v909_v12 = vpop.eup %908  ;;  %v219_v16 = vsel %vm62_vm0, %v907_v11, 0.0  ;;  %922 = vpow2.f32 %v185_v55 }
  0xa7   :  { %v228_v15 = vsel %vm62_vm0, %v909_v12, 0.0  ;;  %v911_v20 = vpop.eup %910  ;;  %v187_v60 = vmul.f32 1.442695, %v1357_v56  ;;  %v189_v26 = vmul.f32 1.442695, %v1363_v14 }
  0xa8   :  { %v110_v22 = vpop.xlane.xlu1 %109  ;;  %v107_v19 = vpop.xlane.xlu0 %106  ;;  %229 = vadd.xlane.f32.xlu1 %v228_v15  ;;  %v225_v31 = vsel %vm62_vm0, %v911_v20, 0.0 }
  0xa9   :  { %220 = vadd.xlane.f32.xlu0 %v219_v16  ;;  %924 = vpow2.f32 %v187_v60  ;;  %v1372_v3 = vsub.f32 %v1146_v30, %v107_v19  ;;  %v1377_v6 = vsub.f32 %v1141_v29, %v110_v22 }
  0xaa   :  { %v913_v23 = vpop.eup %912  ;;  %926 = vpow2.f32 %v189_v26 }
  0xab   :  { %v234_v24 = vsel %vm62_vm0, %v913_v23, 0.0  ;;  %v915_v36 = vpop.eup %914  ;;  %v191_v11 = vmul.f32 1.442695, %v1372_v3  ;;  %v193_v30 = vmul.f32 1.442695, %v1377_v6 }
  0xac   :  { %v116_v27 = vpop.xlane.xlu1 %115  ;;  %v113_v35 = vpop.xlane.xlu0 %112  ;;  %235 = vadd.xlane.f32.xlu1 %v234_v24  ;;  %v231_v47 = vsel %vm62_vm0, %v915_v36, 0.0 }
  0xad   :  { %226 = vadd.xlane.f32.xlu0 %v225_v31  ;;  %928 = vpow2.f32 %v191_v11  ;;  %v1386_v20 = vsub.f32 %v1160_v34, %v113_v35  ;;  %v1393_v31 = vsub.f32 %v1155_v33, %v116_v27 }
  0xae   :  { %v917_v43 = vpop.eup %916  ;;  %930 = vpow2.f32 %v193_v30 }
  0xaf   :  { %v240_v44 = vsel %vm62_vm0, %v917_v43, 0.0  ;;  %v919_v2 = vpop.eup %918  ;;  %v195_v34 = vmul.f32 1.442695, %v1386_v20  ;;  %v197_v27 = vmul.f32 1.442695, %v1393_v31 }
  0xb0   :  { %v1342_v1 = vpop.xlane.xlu1 %121  ;;  %v1345_v48 = vpop.xlane.xlu0 %118  ;;  %241 = vadd.xlane.f32.xlu1 %v240_v44  ;;  %v237_v52 = vsel %vm62_vm0, %v919_v2, 0.0 }
  0xb1   :  { %232 = vadd.xlane.f32.xlu0 %v231_v47  ;;  %v1404_v55 = vsub.f32 %v1174_v38, %v1345_v48  ;;  %932 = vpow2.f32 %v195_v34  ;;  %v1414_v48 = vsub.f32 %v1169_v37, %v1342_v1 }
  0xb2   :  { %v921_v10 = vpop.eup %920  ;;  %934 = vpow2.f32 %v197_v27 }
  0xb3   :  { %v243_v21 = vsel %vm62_vm0, %v921_v10, 0.0  ;;  %v923_v22 = vpop.eup %922  ;;  %v201_v1 = vmul.f32 1.442695, %v1414_v48 }
  0xb4   :  { %v1350_v51 = vpop.xlane.xlu1 %127  ;;  %v1353_v9 = vpop.xlane.xlu0 %124  ;;  %v246_v44 = vsel %vm62_vm0, %v923_v22, 0.0 }
  0xb5   :  { %238 = vadd.xlane.f32.xlu0 %v237_v52 }
  0xb6   :  { %v925_v47 = vpop.eup %924 }
  0xb7   :  { %v927_v26 = vpop.eup %926 }
  0xb8   :  { %v1359_v13 = vpop.xlane.xlu1 %133  ;;  %v1368_v62 = vpop.xlane.xlu0 %130 }
  0xb9   :  { %244 = vadd.xlane.f32.xlu0 %v243_v21 }
  0xbc   :  { %v342_v17 = vpop.permute.xlu1 %341  ;;  %v1379_v7 = vpop.xlane.xlu0 %136 }
  0xbd   :  { %vm415_vm1 = vcmp.eq.s32.totalorder %v1366_v61, %v342_v17  ;;  %v249_v17 = vsel %vm62_vm0, %v925_v47, 0.0 }
  0xbe   :  { %v868_v25 = vsel %vm415_vm1, 1.0, %v1023_v18 }
  0xbf   :  { %v490_v4 = vmul.f32 0.8, %v868_v25 }
  0xc0   :  { %v351_v8 = vpop.permute.xlu1 %350 }
  0xc1   :  { %v515_v12 = vadd.f32 0.0015625, %v490_v4  ;;  %vm418_vm2 = vcmp.eq.s32.totalorder %v1366_v61, %v351_v8 }
  0xc3   :  { %v540_v15 = vmul.f32 %v515_v12, %v1291_v28  ;;  %v871_v28 = vsel %vm418_vm2, 1.0, %v1023_v18  ;;  %v199_v12 = vmul.f32 1.442695, %v1404_v55 }
  0xc4   :  { %v357_v16 = vpop.permute.xlu1 %356  ;;  %v345_v19 = vpop.permute.xlu0 %344  ;;  %v493_v2 = vmul.f32 0.8, %v871_v28  ;;  %v1426_v28 = vsub.f32 %v1188_v42, %v1353_v9  ;;  %v1437_v42 = vsub.f32 %v1183_v41, %v1350_v51 }
  0xc5   :  { %vm416_vm3 = vcmp.eq.s32.totalorder %v1366_v61, %v345_v19  ;;  %v565_v29 = vsel %vm62_vm0, %v540_v15, 0.0  ;;  %vm420_vm5 = vcmp.eq.s32.totalorder %v1366_v61, %v357_v16  ;;  %v252_v19 = vsel %vm62_vm0, %v927_v26, 0.0 }
  0xc6   :  { %v869_v23 = vsel %vm416_vm3, 1.0, %v1023_v18  ;;  %566 = vadd.xlane.f32.xlu1 %v565_v29  ;;  %v518_v25 = vadd.f32 0.0015625, %v493_v2  ;;  %v873_v4 = vsel %vm420_vm5, 1.0, %v1023_v18  ;;  %v929_v29 = vpop.eup %928  ;;  %936 = vpow2.f32 %v199_v12 }
  0xc7   :  { %v491_v24 = vmul.f32 0.8, %v869_v23  ;;  %v495_v16 = vmul.f32 0.8, %v873_v4  ;;  %v931_v34 = vpop.eup %930  ;;  %938 = vpow2.f32 %v201_v1  ;;  %v203_v9 = vmul.f32 1.442695, %v1426_v28 }
  0xc8   :  { %v363_v36 = vpop.permute.xlu1 %362  ;;  %v348_v43 = vpop.permute.xlu0 %347  ;;  %v258_v27 = vsel %vm62_vm0, %v931_v34, 0.0  ;;  %v205_v51 = vmul.f32 1.442695, %v1437_v42  ;;  %v1453_v26 = vsub.f32 %v1202_v46, %v1368_v62  ;;  %v1467_v62 = vsub.f32 %v1197_v45, %v1359_v13 }
  0xc9   :  { %v516_v35 = vadd.f32 0.0015625, %v491_v24  ;;  %vm417_vm4 = vcmp.eq.s32.totalorder %v1366_v61, %v348_v43  ;;  %vm422_vm8 = vcmp.eq.s32.totalorder %v1366_v61, %v363_v36  ;;  %940 = vpow2.f32 %v203_v9 }
  0xca   :  { %v870_v52 = vsel %vm417_vm4, 1.0, %v1023_v18  ;;  %247 = vadd.xlane.f32.xlu1 %v246_v44  ;;  %v255_v44 = vsel %vm62_vm0, %v929_v29, 0.0  ;;  %942 = vpow2.f32 %v205_v51  ;;  %v209_v1 = vmul.f32 1.442695, %v1467_v62 }
  0xcb   :  { %v492_v10 = vmul.f32 0.8, %v870_v52  ;;  %v541_v33 = vmul.f32 %v516_v35, %v1301_v40  ;;  %v520_v35 = vadd.f32 0.0015625, %v495_v16 }
  0xcc   :  { %v366_v59 = vpop.permute.xlu1 %365  ;;  %v354_v21 = vpop.permute.xlu0 %353 }
  0xcd   :  { %v517_v60 = vadd.f32 0.0015625, %v492_v10  ;;  %vm419_vm6 = vcmp.eq.s32.totalorder %v1366_v61, %v354_v21  ;;  %v568_v8 = vsel %vm62_vm0, %v541_v33, 0.0  ;;  %vm423_vm9 = vcmp.eq.s32.totalorder %v1366_v61, %v366_v59  ;;  %v933_v21 = vpop.eup %932 }
  0xce   :  { %v872_v40 = vsel %vm419_vm6, 1.0, %v1023_v18  ;;  %250 = vadd.xlane.f32.xlu1 %v249_v17  ;;  %569 = vadd.xlane.f32.xlu0 %v568_v8  ;;  %v876_v59 = vsel %vm423_vm9, 1.0, %v1023_v18  ;;  %v261_v8 = vsel %vm62_vm0, %v933_v21, 0.0 }
  0xcf   :  { %v494_v11 = vmul.f32 0.8, %v872_v40  ;;  %v542_v38 = vmul.f32 %v517_v60, %v1295_v32  ;;  %v543_v32 = vmul.f32 %v518_v25, %v1298_v39  ;;  %v875_v39 = vsel %vm422_vm8, 1.0, %v1023_v18 }
  0xd0   :  { %v369_v15 = vpop.permute.xlu1 %368  ;;  %v360_v30 = vpop.permute.xlu0 %359  ;;  %v497_v33 = vmul.f32 0.8, %v875_v39  ;;  %v498_v40 = vmul.f32 0.8, %v876_v59 }
  0xd1   :  { %vm421_vm7 = vcmp.eq.s32.totalorder %v1366_v61, %v360_v30  ;;  %v519_v22 = vadd.f32 0.0015625, %v494_v11  ;;  %v571_v23 = vsel %vm62_vm0, %v542_v38, 0.0  ;;  %v574_v47 = vsel %vm62_vm0, %v543_v32, 0.0  ;;  %v935_v11 = vpop.eup %934 }
  0xd2   :  { %253 = vadd.xlane.f32.xlu1 %v252_v19  ;;  %v874_v37 = vsel %vm421_vm7, 1.0, %v1023_v18  ;;  %572 = vadd.xlane.f32.xlu0 %v571_v23  ;;  %vm424_vm11 = vcmp.eq.s32.totalorder %v1366_v61, %v369_v15  ;;  %v522_v4 = vadd.f32 0.0015625, %v497_v33  ;;  %v207_v30 = vmul.f32 1.442695, %v1453_v26 }
  0xd3   :  { %v496_v36 = vmul.f32 0.8, %v874_v37  ;;  %v544_v2 = vmul.f32 %v519_v22, %v1310_v50  ;;  %v545_v50 = vmul.f32 %v520_v35, %v1307_v0  ;;  %v877_v15 = vsel %vm424_vm11, 1.0, %v1023_v18  ;;  %v937_v29 = vpop.eup %936 }
  0xd4   :  { %v372_v24 = vpop.permute.xlu1 %371  ;;  %v1428_v43 = vpop.permute.xlu0 %377  ;;  %v523_v22 = vadd.f32 0.0015625, %v498_v40  ;;  %v547_v45 = vmul.f32 %v522_v4, %v1315_v53  ;;  %v499_v13 = vmul.f32 0.8, %v877_v15  ;;  %944 = vpow2.f32 %v207_v30 }
  0xd5   :  { %v521_v60 = vadd.f32 0.0015625, %v496_v36  ;;  %v577_v41 = vsel %vm62_vm0, %v544_v2, 0.0  ;;  %v580_v12 = vsel %vm62_vm0, %v545_v50, 0.0  ;;  %vm425_vm13 = vcmp.eq.s32.totalorder %v1366_v61, %v372_v24 }
  0xd6   :  { %256 = vadd.xlane.f32.xlu1 %v255_v44  ;;  %575 = vadd.xlane.f32.xlu0 %v574_v47  ;;  %v878_v23 = vsel %vm425_vm13, 1.0, %v1023_v18  ;;  %v1485_v24 = vsub.f32 %v1211_v49, %v1379_v7  ;;  %v267_v35 = vsel %vm62_vm0, %v937_v29, 0.0  ;;  %v939_v44 = vpop.eup %938  ;;  %v586_v36 = vsel %vm62_vm0, %v547_v45, 0.0 }
  0xd7   :  { %v546_v46 = vmul.f32 %v521_v60, %v1318_v54  ;;  %v264_v54 = vsel %vm62_vm0, %v935_v11, 0.0  ;;  %v500_v39 = vmul.f32 0.8, %v878_v23  ;;  %v524_v47 = vadd.f32 0.0015625, %v499_v13  ;;  %v941_v33 = vpop.eup %940 }
  0xd8   :  { %v1440_v52 = vpop.permute.xlu1 %374  ;;  %v396_v10 = vpop.permute.xlu0 %395  ;;  %v548_v7 = vmul.f32 %v523_v22, %v1326_v58  ;;  %vm427_vm3 = vcmp.eq.s32.totalorder %v1366_v61, %v1428_v43  ;;  %946 = vpow2.f32 %v209_v1  ;;  %v270_v50 = vsel %vm62_vm0, %v939_v44, 0.0 }
  0xd9   :  { %vm433_vm10 = vcmp.eq.s32.totalorder %v1366_v61, %v396_v10  ;;  %v583_v37 = vsel %vm62_vm0, %v546_v46, 0.0  ;;  %vm426_vm15 = vcmp.eq.s32.totalorder %v1366_v61, %v1440_v52  ;;  %v211_v52 = vmul.f32 1.442695, %v1485_v24 }
  0xda   :  { %v1447_v17 = vsel %vm433_vm10, 1.0, %v1023_v18  ;;  %259 = vadd.xlane.f32.xlu1 %v258_v27  ;;  %578 = vadd.xlane.f32.xlu0 %v577_v41  ;;  %v879_v9 = vsel %vm426_vm15, 1.0, %v1023_v18  ;;  %v525_v27 = vadd.f32 0.0015625, %v500_v39  ;;  %v880_v21 = vsel %vm427_vm3, 1.0, %v1023_v18  ;;  %v943_v41 = vpop.eup %942 }
  0xdb   :  { %v501_v59 = vmul.f32 0.8, %v879_v9  ;;  %v589_v58 = vsel %vm62_vm0, %v548_v7, 0.0  ;;  %v549_v60 = vmul.f32 %v524_v47, %v1323_v57  ;;  %948 = vpow2.f32 %v211_v52 }
  0xdc   :  { %v1456_v0 = vpop.permute.xlu1 %380  ;;  %v402_v25 = vpop.permute.xlu0 %401  ;;  %v502_v51 = vmul.f32 0.8, %v880_v21  ;;  %v550_v4 = vmul.f32 %v525_v27, %v1332_v63  ;;  %v276_v63 = vsel %vm62_vm0, %v943_v41, 0.0 }
  0xdd   :  { %vm435_vm12 = vcmp.eq.s32.totalorder %v1366_v61, %v402_v25  ;;  %vm428_vm4 = vcmp.eq.s32.totalorder %v1366_v61, %v1456_v0  ;;  %v273_v25 = vsel %vm62_vm0, %v941_v33, 0.0  ;;  %v526_v40 = vadd.f32 0.0015625, %v501_v59 }
  0xde   :  { %v1461_v38 = vsel %vm435_vm12, 1.0, %v1023_v18  ;;  %262 = vadd.xlane.f32.xlu1 %v261_v8  ;;  %581 = vadd.xlane.f32.xlu0 %v580_v12  ;;  %v592_v57 = vsel %vm62_vm0, %v549_v60, 0.0  ;;  %v881_v11 = vsel %vm428_vm4, 1.0, %v1023_v18  ;;  %v527_v46 = vadd.f32 0.0015625, %v502_v51 }
  0xdf   :  { %v595_v15 = vsel %vm62_vm0, %v550_v4, 0.0  ;;  %v503_v30 = vmul.f32 0.8, %v881_v11  ;;  %v551_v22 = vmul.f32 %v526_v40, %v1348_v5  ;;  %v510_v27 = vmul.f32 0.8, %v1461_v38 }
  0xe0   :  { %v1472_v16 = vpop.permute.xlu1 %383  ;;  %v408_v19 = vpop.permute.xlu0 %407 }
  0xe1   :  { %vm437_vm14 = vcmp.eq.s32.totalorder %v1366_v61, %v408_v19  ;;  %vm429_vm7 = vcmp.eq.s32.totalorder %v1366_v61, %v1472_v16  ;;  %v945_v12 = vpop.eup %944  ;;  %v528_v1 = vadd.f32 0.0015625, %v503_v30 }
  0xe2   :  { %v1479_v32 = vsel %vm437_vm14, 1.0, %v1023_v18  ;;  %265 = vadd.xlane.f32.xlu1 %v264_v54  ;;  %584 = vadd.xlane.f32.xlu0 %v583_v37  ;;  %v882_v54 = vsel %vm429_vm7, 1.0, %v1023_v18  ;;  %v279_v23 = vsel %vm62_vm0, %v945_v12, 0.0  ;;  %v552_v37 = vmul.f32 %v527_v46, %v1357_v56 }
  0xe4   :  { %v387_v53 = vpop.permute.xlu1 %386  ;;  %v414_v34 = vpop.permute.xlu0 %413  ;;  %v601_v7 = vsel %vm62_vm0, %v552_v37, 0.0 }
  0xe5   :  { %vm430_vm1 = vcmp.eq.s32.totalorder %v1366_v61, %v387_v53  ;;  %vm439_vm2 = vcmp.eq.s32.totalorder %v1366_v61, %v414_v34  ;;  %v947_v45 = vpop.eup %946  ;;  %v504_v53 = vmul.f32 0.8, %v882_v54 }
  0xe6   :  { %v1494_v2 = vsel %vm430_vm1, 1.0, %v1023_v18  ;;  %v1497_v49 = vsel %vm439_vm2, 1.0, %v1023_v18  ;;  %268 = vadd.xlane.f32.xlu1 %v267_v35  ;;  %587 = vadd.xlane.f32.xlu0 %v586_v36  ;;  %v598_v35 = vsel %vm62_vm0, %v551_v22, 0.0  ;;  %v282_v44 = vsel %vm62_vm0, %v947_v45, 0.0 }
  0xe7   :  { %v508_v36 = vmul.f32 0.8, %v1447_v17  ;;  %v529_v56 = vadd.f32 0.0015625, %v504_v53  ;;  %v505_v9 = vmul.f32 0.8, %v1494_v2 }
  0xe8   :  { %v390_v10 = vpop.permute.xlu1 %389  ;;  %v949_v39 = vpop.eup %948 }
  0xe9   :  { %vm431_vm6 = vcmp.eq.s32.totalorder %v1366_v61, %v390_v10  ;;  %v553_v10 = vmul.f32 %v528_v1, %v1363_v14  ;;  %v533_v33 = vadd.f32 0.0015625, %v508_v36  ;;  %v530_v21 = vadd.f32 0.0015625, %v505_v9 }
  0xea   :  { %271 = vadd.xlane.f32.xlu1 %v270_v50  ;;  %590 = vadd.xlane.f32.xlu0 %v589_v58  ;;  %v884_v19 = vsel %vm431_vm6, 1.0, %v1023_v18  ;;  %v285_v50 = vsel %vm62_vm0, %v949_v39, 0.0  ;;  %v554_v2 = vmul.f32 %v529_v56, %v1372_v3  ;;  %v512_v58 = vmul.f32 0.8, %v1479_v32 }
  0xeb   :  { %v506_v13 = vmul.f32 0.8, %v884_v19  ;;  %v604_v59 = vsel %vm62_vm0, %v553_v10, 0.0  ;;  %v558_v60 = vmul.f32 %v533_v33, %v1404_v55  ;;  %v555_v41 = vmul.f32 %v530_v21, %v1377_v6 }
  0xec   :  { %v393_v43 = vpop.permute.xlu1 %392  ;;  %v537_v51 = vadd.f32 0.0015625, %v512_v58 }
  0xed   :  { %vm432_vm5 = vcmp.eq.s32.totalorder %v1366_v61, %v393_v43  ;;  %v531_v47 = vadd.f32 0.0015625, %v506_v13  ;;  %v619_v3 = vsel %vm62_vm0, %v558_v60, 0.0 }
  0xee   :  { %v885_v8 = vsel %vm432_vm5, 1.0, %v1023_v18  ;;  %274 = vadd.xlane.f32.xlu1 %v273_v25  ;;  %593 = vadd.xlane.f32.xlu0 %v592_v57  ;;  %v514_v25 = vmul.f32 0.8, %v1497_v49  ;;  %v562_v6 = vmul.f32 %v537_v51, %v1453_v26 }
  0xef   :  { %v556_v17 = vmul.f32 %v531_v47, %v1386_v20  ;;  %v607_v20 = vsel %vm62_vm0, %v554_v2, 0.0 }
  0xf0   :  { %v399_v0 = vpop.permute.xlu1 %398  ;;  %v539_v57 = vadd.f32 0.0015625, %v514_v25  ;;  %v631_v46 = vsel %vm62_vm0, %v562_v6, 0.0 }
  0xf1   :  { %vm434_vm8 = vcmp.eq.s32.totalorder %v1366_v61, %v399_v0  ;;  %v613_v14 = vsel %vm62_vm0, %v556_v17, 0.0 }
  0xf2   :  { %v887_v29 = vsel %vm434_vm8, 1.0, %v1023_v18  ;;  %277 = vadd.xlane.f32.xlu1 %v276_v63  ;;  %596 = vadd.xlane.f32.xlu0 %v595_v15  ;;  %v564_v63 = vmul.f32 %v539_v57, %v1485_v24 }
  0xf3   :  { %v509_v43 = vmul.f32 0.8, %v887_v29 }
  0xf4   :  { %v405_v16 = vpop.permute.xlu1 %404  ;;  %v637_v26 = vsel %vm62_vm0, %v564_v63, 0.0 }
  0xf5   :  { %vm436_vm9 = vcmp.eq.s32.totalorder %v1366_v61, %v405_v16  ;;  %v534_v32 = vadd.f32 0.0015625, %v509_v43 }
  0xf6   :  { %v889_v34 = vsel %vm436_vm9, 1.0, %v1023_v18  ;;  %280 = vadd.xlane.f32.xlu1 %v279_v23  ;;  %599 = vadd.xlane.f32.xlu0 %v598_v35 }
  0xf7   :  { %v511_v40 = vmul.f32 0.8, %v889_v34 }
  0xf8   :  { %v411_v5 = vpop.permute.xlu1 %410 }
  0xf9   :  { %vm438_vm10 = vcmp.eq.s32.totalorder %v1366_v61, %v411_v5  ;;  %v507_v61 = vmul.f32 0.8, %v885_v8  ;;  %v610_v8 = vsel %vm62_vm0, %v555_v41, 0.0  ;;  %v536_v0 = vadd.f32 0.0015625, %v511_v40 }
  0xfa   :  { %v891_v52 = vsel %vm438_vm10, 1.0, %v1023_v18  ;;  %283 = vadd.xlane.f32.xlu1 %v282_v44  ;;  %602 = vadd.xlane.f32.xlu0 %v601_v7  ;;  %v535_v18 = vadd.f32 0.0015625, %v510_v27 }
  0xfb   :  { %v532_v38 = vadd.f32 0.0015625, %v507_v61  ;;  %v513_v12 = vmul.f32 0.8, %v891_v52  ;;  %v561_v30 = vmul.f32 %v536_v0, %v1437_v42 }
  0xfc   :  { %v560_v4 = vmul.f32 %v535_v18, %v1426_v28  ;;  %v559_v28 = vmul.f32 %v534_v32, %v1414_v48 }
  0xfd   :  { %v557_v55 = vmul.f32 %v532_v38, %v1393_v31  ;;  %v538_v15 = vadd.f32 0.0015625, %v513_v12  ;;  %v628_v19 = vsel %vm62_vm0, %v561_v30, 0.0 }
  0xfe   :  { %286 = vadd.xlane.f32.xlu1 %v285_v50  ;;  %605 = vadd.xlane.f32.xlu0 %v604_v59  ;;  %v625_v11 = vsel %vm62_vm0, %v560_v4, 0.0  ;;  %v622_v31 = vsel %vm62_vm0, %v559_v28, 0.0 }
  0xff   :  { %v616_v49 = vsel %vm62_vm0, %v557_v55, 0.0  ;;  %v563_v29 = vmul.f32 %v538_v15, %v1467_v62 }
 0x101   :  { %v634_v48 = vsel %vm62_vm0, %v563_v29, 0.0  ;;  %vm793_vm0 = vcmask 7168  }
 0x102   :  { %614 = vadd.xlane.f32.xlu1 %v613_v14  ;;  %608 = vadd.xlane.f32.xlu0 %v607_v20 }
 0x106   :  { %620 = vadd.xlane.f32.xlu1 %v619_v3  ;;  %611 = vadd.xlane.f32.xlu0 %v610_v8 }
 0x10a   :  { %626 = vadd.xlane.f32.xlu1 %v625_v11  ;;  %617 = vadd.xlane.f32.xlu0 %v616_v49 }
 0x10e   :  { %632 = vadd.xlane.f32.xlu1 %v631_v46  ;;  %623 = vadd.xlane.f32.xlu0 %v622_v31 }
 0x112   :  { %638 = vadd.xlane.f32.xlu1 %v637_v26  ;;  %629 = vadd.xlane.f32.xlu0 %v628_v19 }
 0x116   :  { %635 = vadd.xlane.f32.xlu0 %v634_v48 }
 0x129   :  { %v215_v22 = vpop.xlane.xlu1 %214 }
 0x12d   :  { %v224_v54 = vpop.xlane.xlu1 %223 }
 0x12e   :  { %v218_v24 = vpop.xlane.xlu0 %217 }
 0x12f   :  { %950 = vlog2.f32 %v218_v24 }
 0x130   :  { %952 = vlog2.f32 %v215_v22 }
 0x131   :  { %v230_v45 = vpop.xlane.xlu1 %229 }
 0x132   :  { %v221_v16 = vpop.xlane.xlu0 %220 }
 0x133   :  { %954 = vlog2.f32 %v221_v16 }
 0x134   :  { %956 = vlog2.f32 %v224_v54 }
 0x135   :  { %v236_v23 = vpop.xlane.xlu1 %235 }
 0x136   :  { %v227_v13 = vpop.xlane.xlu0 %226 }
 0x137   :  { %958 = vlog2.f32 %v227_v13 }
 0x138   :  { %960 = vlog2.f32 %v230_v45 }
 0x139   :  { %v242_v37 = vpop.xlane.xlu1 %241 }
 0x13a   :  { %v233_v42 = vpop.xlane.xlu0 %232 }
 0x13b   :  { %962 = vlog2.f32 %v233_v42 }
 0x13c   :  { %964 = vlog2.f32 %v236_v23  ;;  %v951_v52 = vpop.eup %950 }
 0x13d   :  { %v953_v33 = vpop.eup %952  ;;  %v291_v17 = vmul.f32 0.6931472, %v951_v52 }
 0x13e   :  { %v239_v1 = vpop.xlane.xlu0 %238  ;;  %v289_v61 = vmul.f32 0.6931472, %v953_v33 }
 0x13f   :  { %966 = vlog2.f32 %v239_v1  ;;  %v641_v14 = vmul.f32 0.9, %v291_v17 }
 0x140   :  { %v955_v27 = vpop.eup %954  ;;  %968 = vlog2.f32 %v242_v37  ;;  %v640_v43 = vmul.f32 0.9, %v289_v61 }
 0x141   :  { %v957_v50 = vpop.eup %956  ;;  %v293_v2 = vmul.f32 0.6931472, %v955_v27 }
 0x142   :  { %v245_v35 = vpop.xlane.xlu0 %244  ;;  %v295_v58 = vmul.f32 0.6931472, %v957_v50 }
 0x143   :  { %970 = vlog2.f32 %v245_v35  ;;  %v642_v51 = vmul.f32 0.9, %v293_v2 }
 0x144   :  { %v959_v18 = vpop.eup %958  ;;  %v643_v4 = vmul.f32 0.9, %v295_v58 }
 0x145   :  { %v961_v38 = vpop.eup %960  ;;  %v297_v25 = vmul.f32 0.6931472, %v959_v18 }
 0x146   :  { %v299_v55 = vmul.f32 0.6931472, %v961_v38 }
 0x147   :  { %v644_v49 = vmul.f32 0.9, %v297_v25 }
 0x148   :  { %v963_v3 = vpop.eup %962  ;;  %v645_v30 = vmul.f32 0.9, %v299_v55 }
 0x149   :  { %v965_v32 = vpop.eup %964  ;;  %v301_v28 = vmul.f32 0.6931472, %v963_v3 }
 0x14a   :  { %v303_v46 = vmul.f32 0.6931472, %v965_v32 }
 0x14b   :  { %v646_v16 = vmul.f32 0.9, %v301_v28 }
 0x14c   :  { %v967_v6 = vpop.eup %966  ;;  %v647_v23 = vmul.f32 0.9, %v303_v46 }
 0x14d   :  { %v969_v19 = vpop.eup %968  ;;  %v305_v48 = vmul.f32 0.6931472, %v967_v6 }
 0x14f   :  { %v1565_v53 = vpop.xlane.xlu1 %566 }
 0x150   :  { %v665_v40 = vsub.f32 %v640_v43, %v1565_v53  ;;  %v971_v45 = vpop.eup %970  ;;  %v307_v53 = vmul.f32 0.6931472, %v969_v19 }
 0x152   :  { %v794_v63 = vsel %vm793_vm0, %v665_v40, 0.0 }
 0x153   :  { %v248_v34 = vpop.xlane.xlu1 %247 }
 0x154   :  { %972 = vlog2.f32 %v248_v34 }
 0x157   :  { %v251_v5 = vpop.xlane.xlu1 %250  ;;  %v570_v62 = vpop.xlane.xlu0 %569 }
 0x158   :  { %974 = vlog2.f32 %v251_v5  ;;  %v666_v41 = vsub.f32 %v641_v14, %v570_v62  ;;  %v648_v5 = vmul.f32 0.9, %v305_v48 }
 0x15a   :  { %v795_v0 = vsel %vm793_vm0, %v666_v41, 0.0 }
 0x15b   :  { %v254_v44 = vpop.xlane.xlu1 %253  ;;  %v573_v39 = vpop.xlane.xlu0 %572  ;;  %v796_v29 = vadd.f32 %v795_v0, %v794_v63 }
 0x15c   :  { %976 = vlog2.f32 %v254_v44  ;;  %v667_v8 = vsub.f32 %v642_v51, %v573_v39 }
 0x15e   :  { %v797_v15 = vsel %vm793_vm0, %v667_v8, 0.0 }
 0x15f   :  { %v257_v36 = vpop.xlane.xlu1 %256  ;;  %v576_v47 = vpop.xlane.xlu0 %575  ;;  %v798_v13 = vadd.f32 %v797_v15, %v796_v29 }
 0x160   :  { %v668_v12 = vsub.f32 %v643_v4, %v576_v47  ;;  %978 = vlog2.f32 %v257_v36  ;;  %v309_v36 = vmul.f32 0.6931472, %v971_v45 }
 0x161   :  { %v973_v42 = vpop.eup %972 }
 0x162   :  { %v799_v24 = vsel %vm793_vm0, %v668_v12, 0.0  ;;  %v650_v2 = vmul.f32 0.9, %v309_v36 }
 0x163   :  { %v260_v7 = vpop.xlane.xlu1 %259  ;;  %v1567_v56 = vpop.xlane.xlu0 %578  ;;  %v800_v35 = vadd.f32 %v799_v24, %v798_v13 }
 0x164   :  { %v669_v31 = vsub.f32 %v644_v49, %v1567_v56  ;;  %980 = vlog2.f32 %v260_v7  ;;  %v311_v56 = vmul.f32 0.6931472, %v973_v42 }
 0x165   :  { %v975_v47 = vpop.eup %974 }
 0x166   :  { %v801_v37 = vsel %vm793_vm0, %v669_v31, 0.0  ;;  %v651_v58 = vmul.f32 0.9, %v311_v56 }
 0x167   :  { %v263_v9 = vpop.xlane.xlu1 %262  ;;  %v1569_v10 = vpop.xlane.xlu0 %581  ;;  %v802_v7 = vadd.f32 %v801_v37, %v800_v35 }
 0x168   :  { %v670_v54 = vsub.f32 %v645_v30, %v1569_v10  ;;  %982 = vlog2.f32 %v263_v9  ;;  %v649_v10 = vmul.f32 0.9, %v307_v53 }
 0x169   :  { %v977_v27 = vpop.eup %976 }
 0x16a   :  { %v803_v44 = vsel %vm793_vm0, %v670_v54, 0.0 }
 0x16b   :  { %v266_v21 = vpop.xlane.xlu1 %265  ;;  %v1571_v59 = vpop.xlane.xlu0 %584  ;;  %v804_v50 = vadd.f32 %v803_v44, %v802_v7 }
 0x16c   :  { %v671_v1 = vsub.f32 %v646_v16, %v1571_v59  ;;  %984 = vlog2.f32 %v266_v21  ;;  %v313_v21 = vmul.f32 0.6931472, %v975_v47 }
 0x16d   :  { %v979_v14 = vpop.eup %978 }
 0x16e   :  { %v805_v52 = vsel %vm793_vm0, %v671_v1, 0.0  ;;  %v652_v4 = vmul.f32 0.9, %v313_v21  ;;  %v317_v40 = vmul.f32 0.6931472, %v979_v14 }
 0x16f   :  { %v269_v60 = vpop.xlane.xlu1 %268  ;;  %v1573_v20 = vpop.xlane.xlu0 %587  ;;  %v806_v18 = vadd.f32 %v805_v52, %v804_v50 }
 0x170   :  { %v672_v39 = vsub.f32 %v647_v23, %v1573_v20  ;;  %986 = vlog2.f32 %v269_v60  ;;  %v315_v20 = vmul.f32 0.6931472, %v977_v27  ;;  %v654_v31 = vmul.f32 0.9, %v317_v40 }
 0x171   :  { %v981_v8 = vpop.eup %980 }
 0x172   :  { %v807_v61 = vsel %vm793_vm0, %v672_v39, 0.0  ;;  %v653_v6 = vmul.f32 0.9, %v315_v20  ;;  %v319_v48 = vmul.f32 0.6931472, %v981_v8 }
 0x173   :  { %v272_v57 = vpop.xlane.xlu1 %271  ;;  %v591_v11 = vpop.xlane.xlu0 %590  ;;  %v808_v41 = vadd.f32 %v807_v61, %v806_v18 }
 0x174   :  { %v673_v9 = vsub.f32 %v648_v5, %v591_v11  ;;  %988 = vlog2.f32 %v272_v57 }
 0x175   :  { %v983_v0 = vpop.eup %982 }
 0x176   :  { %v809_v60 = vsel %vm793_vm0, %v673_v9, 0.0  ;;  %v321_v19 = vmul.f32 0.6931472, %v983_v0 }
 0x177   :  { %v275_v26 = vpop.xlane.xlu1 %274  ;;  %v594_v22 = vpop.xlane.xlu0 %593  ;;  %v810_v32 = vadd.f32 %v809_v60, %v808_v41 }
 0x178   :  { %v674_v59 = vsub.f32 %v649_v10, %v594_v22  ;;  %990 = vlog2.f32 %v275_v26  ;;  %v656_v37 = vmul.f32 0.9, %v321_v19 }
 0x179   :  { %v985_v63 = vpop.eup %984 }
 0x17a   :  { %v811_v25 = vsel %vm793_vm0, %v674_v59, 0.0  ;;  %v323_v23 = vmul.f32 0.6931472, %v985_v63 }
 0x17b   :  { %v278_v34 = vpop.xlane.xlu1 %277  ;;  %v597_v62 = vpop.xlane.xlu0 %596  ;;  %v812_v12 = vadd.f32 %v811_v25, %v810_v32 }
 0x17c   :  { %v675_v38 = vsub.f32 %v650_v2, %v597_v62  ;;  %992 = vlog2.f32 %v278_v34  ;;  %v655_v34 = vmul.f32 0.9, %v319_v48  ;;  %v657_v56 = vmul.f32 0.9, %v323_v23 }
 0x17d   :  { %v987_v30 = vpop.eup %986 }
 0x17e   :  { %v813_v55 = vsel %vm793_vm0, %v675_v38, 0.0  ;;  %v325_v13 = vmul.f32 0.6931472, %v987_v30 }
 0x17f   :  { %v281_v33 = vpop.xlane.xlu1 %280  ;;  %v600_v17 = vpop.xlane.xlu0 %599  ;;  %v814_v15 = vadd.f32 %v813_v55, %v812_v12 }
 0x180   :  { %v676_v3 = vsub.f32 %v651_v58, %v600_v17  ;;  %994 = vlog2.f32 %v281_v33  ;;  %v658_v7 = vmul.f32 0.9, %v325_v13 }
 0x181   :  { %v989_v42 = vpop.eup %988 }
 0x182   :  { %v815_v28 = vsel %vm793_vm0, %v676_v3, 0.0  ;;  %v327_v27 = vmul.f32 0.6931472, %v989_v42 }
 0x183   :  { %v284_v43 = vpop.xlane.xlu1 %283  ;;  %v603_v51 = vpop.xlane.xlu0 %602  ;;  %v816_v22 = vadd.f32 %v815_v28, %v814_v15 }
 0x184   :  { %v677_v57 = vsub.f32 %v652_v4, %v603_v51  ;;  %996 = vlog2.f32 %v284_v43  ;;  %v659_v43 = vmul.f32 0.9, %v327_v27 }
 0x185   :  { %v991_v35 = vpop.eup %990 }
 0x186   :  { %v817_v26 = vsel %vm793_vm0, %v677_v57, 0.0  ;;  %v329_v10 = vmul.f32 0.6931472, %v991_v35 }
 0x187   :  { %v287_v11 = vpop.xlane.xlu1 %286  ;;  %v606_v49 = vpop.xlane.xlu0 %605  ;;  %v818_v45 = vadd.f32 %v817_v26, %v816_v22 }
 0x188   :  { %v678_v46 = vsub.f32 %v653_v6, %v606_v49  ;;  %998 = vlog2.f32 %v287_v11  ;;  %v660_v60 = vmul.f32 0.9, %v329_v10 }
 0x189   :  { %v993_v36 = vpop.eup %992 }
 0x18a   :  { %v819_v54 = vsel %vm793_vm0, %v678_v46, 0.0  ;;  %v331_v58 = vmul.f32 0.6931472, %v993_v36 }
 0x18b   :  { %v615_v29 = vpop.xlane.xlu1 %614  ;;  %v609_v24 = vpop.xlane.xlu0 %608  ;;  %v820_v5 = vadd.f32 %v819_v54, %v818_v45 }
 0x18c   :  { %v679_v16 = vsub.f32 %v654_v31, %v609_v24  ;;  %v681_v44 = vsub.f32 %v656_v37, %v615_v29  ;;  %v661_v55 = vmul.f32 0.9, %v331_v58 }
 0x18d   :  { %v995_v52 = vpop.eup %994 }
 0x18e   :  { %v821_v1 = vsel %vm793_vm0, %v679_v16, 0.0  ;;  %v825_v61 = vsel %vm793_vm0, %v681_v44, 0.0  ;;  %v333_v18 = vmul.f32 0.6931472, %v995_v52 }
 0x18f   :  { %v621_v53 = vpop.xlane.xlu1 %620  ;;  %v612_v62 = vpop.xlane.xlu0 %611  ;;  %v822_v47 = vadd.f32 %v821_v1, %v820_v5 }
 0x190   :  { %v680_v39 = vsub.f32 %v655_v34, %v612_v62  ;;  %v683_v59 = vsub.f32 %v658_v7, %v621_v53  ;;  %v662_v40 = vmul.f32 0.9, %v333_v18 }
 0x191   :  { %v997_v14 = vpop.eup %996 }
 0x192   :  { %v823_v9 = vsel %vm793_vm0, %v680_v39, 0.0  ;;  %v829_v3 = vsel %vm793_vm0, %v683_v59, 0.0  ;;  %v335_v6 = vmul.f32 0.6931472, %v997_v14 }
 0x193   :  { %v627_v33 = vpop.xlane.xlu1 %626  ;;  %v824_v50 = vadd.f32 %v823_v9, %v822_v47  ;;  %v618_v17 = vpop.xlane.xlu0 %617 }
 0x194   :  { %v682_v2 = vsub.f32 %v657_v56, %v618_v17  ;;  %v685_v4 = vsub.f32 %v660_v60, %v627_v33  ;;  %v663_v26 = vmul.f32 0.9, %v335_v6 }
 0x195   :  { %v826_v21 = vadd.f32 %v825_v61, %v824_v50  ;;  %v999_v20 = vpop.eup %998 }
 0x196   :  { %v827_v38 = vsel %vm793_vm0, %v682_v2, 0.0  ;;  %v337_v11 = vmul.f32 0.6931472, %v999_v20  ;;  %v833_v49 = vsel %vm793_vm0, %v685_v4, 0.0 }
 0x197   :  { %v828_v41 = vadd.f32 %v827_v38, %v826_v21  ;;  %v633_v51 = vpop.xlane.xlu1 %632  ;;  %v624_v25 = vpop.xlane.xlu0 %623 }
 0x198   :  { %v684_v32 = vsub.f32 %v659_v43, %v624_v25  ;;  %v687_v28 = vsub.f32 %v662_v40, %v633_v51  ;;  %v664_v31 = vmul.f32 0.9, %v337_v11 }
 0x199   :  { %v830_v8 = vadd.f32 %v829_v3, %v828_v41 }
 0x19a   :  { %v831_v57 = vsel %vm793_vm0, %v684_v32, 0.0  ;;  %v837_v48 = vsel %vm793_vm0, %v687_v28, 0.0 }
 0x19b   :  { %v832_v0 = vadd.f32 %v831_v57, %v830_v8  ;;  %v630_v12 = vpop.xlane.xlu0 %629  ;;  %v639_v63 = vpop.xlane.xlu1 %638 }
 0x19c   :  { %v686_v46 = vsub.f32 %v661_v55, %v630_v12  ;;  %v689_v22 = vsub.f32 %v664_v31, %v639_v63 }
 0x19d   :  { %v834_v15 = vadd.f32 %v833_v49, %v832_v0 }
 0x19e   :  { %v835_v30 = vsel %vm793_vm0, %v686_v46, 0.0  ;;  %v841_v13 = vsel %vm793_vm0, %v689_v22, 0.0 }
 0x19f   :  { %v836_v19 = vadd.f32 %v835_v30, %v834_v15  ;;  %v636_v29 = vpop.xlane.xlu0 %635 }
 0x1a0   :  { %v688_v24 = vsub.f32 %v663_v26, %v636_v29 }
 0x1a1   :  { %v838_v54 = vadd.f32 %v837_v48, %v836_v19 }
 0x1a2   :  { %v839_v16 = vsel %vm793_vm0, %v688_v24, 0.0 }
 0x1a3   :  { %v840_v45 = vadd.f32 %v839_v16, %v838_v54 }
 0x1a5   :  { %v842_v23 = vadd.f32 %v841_v13, %v840_v45 }
 0x1a7   :  { %843 = vadd.xlane.f32.xlu0 %v842_v23 }
 0x230   :  { %v844_v42 = vpop.xlane.xlu0 %843 }
 0x231   :  { %v845_v37 = vrot.slane %v844_v42, 4 }
 0x233   :  { %v846_v1 = vadd.f32 %v845_v37, %v844_v42 }
 0x235   :  { %v847_v53 = vrot.slane %v846_v1, 2 }
 0x237   :  { %v848_v34 = vadd.f32 %v847_v53, %v846_v1 }
 0x239   :  { %v849_v35 = vrot.slane %v848_v34, 1 }
 0x23b   :  { %v850_v5 = vadd.f32 %v849_v35, %v848_v34 }
 0x23d   :  { %893 = vpush %v850_v5 }
 0x26e   :  { %s894_s24 = spop %893 }
 0x26f   :  { %v852_v62 = vstv %s894_s24 }
 0x270   :  { %853 = vst [vmem:[#allocation2] sm:$0xff] %v852_v62 }
 0x271   :  { %1011 = shalt.err (!%p1008_p4)
}
 0x272   :  { %863 = dma.vmem_to_hbm [thread:$0]  %s861_s23, 128, %s1610_s2, [#allocation3]  }
 0x273   :  { %1020 = dma.done.wait [#allocation3], 128  }
 0x274   :  { %1021 = vsyncadd [#allocation3], 4294967168 }
 0x275   :  { %867 = vsyncpa [#allocation3], 1 }

</bundles_post_ra>
